<compile_context>
chip_gen: v7x
topology: tpu7x:2x2x1
jax: 0.10.0
libtpu: 0.0.40
codegen_flags: <defaults>
</compile_context>

<pallas_src>
import numpy as np
import jax
import jax.numpy as jnp
from jax.experimental import pallas as pl
from jax.experimental.pallas import tpu as pltpu


def _round_up(x, m):
    return ((x + m - 1) // m) * m


# ---------------------------------------------------------------------------
# Kernel bodies
# ---------------------------------------------------------------------------

def _tikhonov_kernel_fulln(x_ref, x0_ref, var_ref, w2_ref, ht_ref, fcomb_ref, out_ref):
    """Single grid axis over batch tiles; full N columns produced per step."""
    x0 = x0_ref[...]                                                   # (TB, N) f32
    # residual: m = x - x0 @ H_fwd.T   (bf16 x bf16 on the MXU, f32 accumulate)
    m = x_ref[...] - jnp.dot(x0.astype(ht_ref.dtype), ht_ref[...],
                             preferred_element_type=jnp.float32)       # (TB, M) f32
    # Wiener gain (reciprocal on the EUP slot); elementwise path stays f32
    w2 = w2_ref[...]                                                   # (1, M)
    y1 = (w2 * pl.reciprocal(w2 + var_ref[...], approx=True)) * m      # (TB, M) f32
    # fused completion + inverse: out = x0 + y1 @ F_comb
    out_ref[...] = x0 + jnp.dot(y1.astype(fcomb_ref.dtype), fcomb_ref[...],
                                preferred_element_type=jnp.float32)


def _tikhonov_kernel_coltiled(x_ref, x0_ref, x0c_ref, var_ref, w2_ref, ht_ref,
                              fcomb_ref, out_ref, y1_ref):
    """Two grid axes: (batch tiles, output-column slabs).  For large N."""
    j = pl.program_id(1)

    # residual + Wiener denoise once per batch tile (first column step only)
    @pl.when(j == 0)
    def _():
        m = x_ref[...] - jnp.dot(x0_ref[...].astype(ht_ref.dtype), ht_ref[...],
                                 preferred_element_type=jnp.float32)   # (TB, M) f32
        w2 = w2_ref[...]
        y1_ref[...] = (w2 * pl.reciprocal(w2 + var_ref[...], approx=True)) * m

    # out[:, cols_j] = x0[:, cols_j] + y1 @ F_comb[:, cols_j]
    out_ref[...] = x0c_ref[...] + jnp.dot(y1_ref[...].astype(fcomb_ref.dtype),
                                          fcomb_ref[...],
                                          preferred_element_type=jnp.float32)


# ---------------------------------------------------------------------------
# One-time operator setup + jitted forward
# ---------------------------------------------------------------------------

def make_tikhonov(denoise_weights, comp, H_fwd, F_inv, *,
                  weight_dtype=jnp.bfloat16, batch_tile=256, col_tile=None):
    """Returns a jitted forward(x, x0, var) -> (B, N).

    denoise_weights:(M,), comp:(N-M,M), H_fwd:(M,N), F_inv:(N,N).
    col_tile: if set (multiple of 128 dividing N), stream F_comb / the output in
    (M, col_tile) slabs so the resident weights fit small-VMEM chips at large N.
    """
    assert batch_tile % 8 == 0, "batch_tile must be a multiple of 8 (sublane)"
    M, N = H_fwd.shape
    if col_tile is None or col_tile >= N:
        TN, n_col = N, 1
    else:
        TN = int(col_tile)
        assert TN % 128 == 0 and N % TN == 0, "col_tile must be a multiple of 128 dividing N"
        n_col = N // TN

    # ---- hoisted, per-operator preprocessing (runs once, not per call) ----
    w2 = (jnp.asarray(denoise_weights, jnp.float32) ** 2).reshape(1, M)       # (1, M)
    ht = jnp.asarray(H_fwd, jnp.float32).T                                    # (N, M)
    finv = jnp.asarray(F_inv, jnp.float32)
    fcomb = finv[:M, :] + jnp.asarray(comp, jnp.float32).T @ finv[M:, :]      # (M, N)
    ht = ht.astype(weight_dtype)          # exact in bf16 (Hadamard +/-1)
    fcomb = fcomb.astype(weight_dtype)    # ~4e-3 rel. error in bf16 (acceptable here)
    wb = jnp.dtype(weight_dtype).itemsize

    try:
        vmem_cap = int(pltpu.get_tpu_info().vmem_capacity_bytes)
    except Exception:  # pragma: no cover - conservative fallback
        vmem_cap = 64 * 1024 * 1024

    def _vmem_bytes(tb):
        v = N * M * wb                                    # ht, single-buffered
        v += M * TN * wb * (1 if n_col == 1 else 2)       # fcomb (double-buffered if tiled)
        v += 8 * 128 * 4                                  # w2 (padded tile)
        act_cols = M + N + M + TN                         # x, x0, var, out (f32, 2 buffers)
        if n_col > 1:
            act_cols += TN                                # x0 column operand
        v += 2 * 4 * tb * act_cols
        if n_col > 1:
            v += tb * M * 4                               # y1 scratch
        return v

    def forward(x, x0, var):
        B = x.shape[0]
        x = jnp.asarray(x, jnp.float32)
        x0 = jnp.asarray(x0, jnp.float32)
        var = jnp.asarray(var, jnp.float32)

        # No jnp.pad: rows are independent, so the last partial batch block can run
        # with unspecified padded rows; Pallas drops out-of-bounds output writes.
        TB = min(batch_tile, _round_up(B, 8))
        nb = pl.cdiv(B, TB)

        vmem_limit = min(int(0.9 * vmem_cap),
                         max(32 * 1024 * 1024, int(1.5 * _vmem_bytes(TB))))
        cost = pl.CostEstimate(
            flops=4 * B * M * N,
            transcendentals=B * M,
            bytes_accessed=(4 * B * (2 * M + (3 if n_col > 1 else 2) * N)
                            + wb * 2 * M * N + 4 * M))

        resident = dict(pipeline_mode=pl.Buffered(1))     # grid-invariant -> single buffer

        if n_col == 1:
            grid = (nb,)
            in_specs = [
                pl.BlockSpec((TB, M), lambda i: (i, 0)),              # x
                pl.BlockSpec((TB, N), lambda i: (i, 0)),              # x0
                pl.BlockSpec((TB, M), lambda i: (i, 0)),              # var
                pl.BlockSpec((1, M), lambda i: (0, 0), **resident),   # w^2
                pl.BlockSpec((N, M), lambda i: (0, 0), **resident),   # H_fwd.T (bf16)
                pl.BlockSpec((M, N), lambda i: (0, 0), **resident),   # F_comb  (bf16)
            ]
            out_specs = pl.BlockSpec((TB, N), lambda i: (i, 0))
            kernel = _tikhonov_kernel_fulln
            operands = (x, x0, var, w2, ht, fcomb)
            scratch = []
            dims = ("parallel",)
        else:
            grid = (nb, n_col)
            in_specs = [
                pl.BlockSpec((TB, M), lambda i, j: (i, 0)),              # x
                pl.BlockSpec((TB, N), lambda i, j: (i, 0)),              # x0 (full, residual matmul)
                pl.BlockSpec((TB, TN), lambda i, j: (i, j)),             # x0 column slab (final add)
                pl.BlockSpec((TB, M), lambda i, j: (i, 0)),              # var
                pl.BlockSpec((1, M), lambda i, j: (0, 0), **resident),   # w^2
                pl.BlockSpec((N, M), lambda i, j: (0, 0), **resident),   # H_fwd.T (bf16)
                pl.BlockSpec((M, TN), lambda i, j: (0, j)),              # F_comb column slab (bf16)
            ]
            out_specs = pl.BlockSpec((TB, TN), lambda i, j: (i, j))
            kernel = _tikhonov_kernel_coltiled
            operands = (x, x0, x0, var, w2, ht, fcomb)
            scratch = [pltpu.VMEM((TB, M), jnp.float32)]                 # y1 carried across j
            dims = ("parallel", "arbitrary")

        # NOTE: input_output_aliases={1: 0} (donate x0's buffer to the output) is a
        # further free win when callers do not need x0 after the call; omitted here to
        # keep forward() pure.
        out = pl.pallas_call(
            kernel,
            out_shape=jax.ShapeDtypeStruct((B, N), jnp.float32),
            grid=grid,
            in_specs=in_specs,
            out_specs=out_specs,
            scratch_shapes=scratch,
            compiler_params=pltpu.CompilerParams(
                dimension_semantics=dims,
                vmem_limit_bytes=vmem_limit),
            cost_estimate=cost,
        )(*operands)
        return out

    return jax.jit(forward)


# ---------------------------------------------------------------------------
# Self-test
# ---------------------------------------------------------------------------

def _hadamard(n):
    """Sylvester Hadamard matrix of size n (n a power of 2)."""
    H = np.array([[1.0]], dtype=np.float64)
    while H.shape[0] < n:
        H = np.block([[H, H], [H, -H]])
    return H


def _reference(x, x0, var, w, comp, H_fwd, F_inv):
    """numpy float64 reference of the (unfused) PyTorch forward()."""
    m = x - x0 @ H_fwd.T
    w2 = w ** 2
    y1 = (w2 / (w2 + var)) * m
    y2 = y1 @ comp.T
    y = np.concatenate([y1, y2], axis=-1)
    return x0 + y @ F_inv


if __name__ == "__main__":
    # Small shapes consistent with the module: image 16x16 -> N=256, M=128.
    img = 16
    N = img * img          # 256
    M = 128
    B = 10                 # not a multiple of 8 -> exercises the partial-block path

    key = jax.random.PRNGKey(0)
    k_sig, k_x, k_x0, k_var = jax.random.split(key, 4)

    # Deterministic synthetic PSD covariance prior (plays the role of `sigma`)
    A = jax.random.normal(k_sig, (N, N), dtype=jnp.float32)
    sigma = (A @ A.T) / N + 0.5 * jnp.eye(N, dtype=jnp.float32)

    # __init__ logic (parameter setup, plain JAX glue)
    var_prior = jnp.diag(sigma)[:M]
    denoise_weights = jnp.sqrt(var_prior)                       # (M,)
    Sigma1 = sigma[:M, :M]
    Sigma21 = sigma[M:, :M]
    comp = jnp.linalg.solve(Sigma1.T, Sigma21.T).T              # (N-M, M)

    # Synthetic HadamSplit measurement operator
    Had = _hadamard(N)                                          # (N, N), entries +/-1
    H_fwd = jnp.asarray(Had[:M, :], dtype=jnp.float32)          # forward_H(x0) = x0 @ H_fwd.T
    F_inv = jnp.asarray(Had / N, dtype=jnp.float32)             # inverse(y)    = y  @ F_inv

    # Inputs
    x = jax.random.normal(k_x, (B, M), dtype=jnp.float32)       # measurements m
    x0 = jax.random.normal(k_x0, (B, N), dtype=jnp.float32)     # prior image
    var = jax.random.uniform(k_var, (B, M), dtype=jnp.float32,
                             minval=0.1, maxval=1.0)            # noise variance

    ref = _reference(np.asarray(x, np.float64), np.asarray(x0, np.float64),
                     np.asarray(var, np.float64),
                     np.asarray(denoise_weights, np.float64),
                     np.asarray(comp, np.float64),
                     np.asarray(H_fwd, np.float64),
                     np.asarray(F_inv, np.float64))

    # 1) default path: full-N output per step, weights fully resident.
    tik_full = make_tikhonov(denoise_weights, comp, H_fwd, F_inv)
    out_full = jax.block_until_ready(tik_full(x, x0, var))
    np.testing.assert_allclose(np.asarray(out_full), ref, rtol=2e-2, atol=2e-2)

    # 2) column-tiled path (what you would use for img=64 / N=4096 on v7x):
    #    small tiles here purely to exercise the (batch x column) grid + scratch carry.
    tik_tiled = make_tikhonov(denoise_weights, comp, H_fwd, F_inv,
                              batch_tile=8, col_tile=128)
    out_tiled = jax.block_until_ready(tik_tiled(x, x0, var))
    np.testing.assert_allclose(np.asarray(out_tiled), ref, rtol=2e-2, atol=2e-2)

    print("KERNEL_OK")
</pallas_src>

<mosaic_0001>
module attributes {stable_mosaic.version = 11 : i64} {
  func.func @_tikhonov_kernel_fulln(%arg0: i32, %arg1: memref<16x128xf32, #tpu.memory_space<vmem>>, %arg2: memref<16x256xf32, #tpu.memory_space<vmem>>, %arg3: memref<16x128xf32, #tpu.memory_space<vmem>>, %arg4: memref<1x128xf32, #tpu.memory_space<vmem>>, %arg5: memref<256x128xbf16, #tpu.memory_space<vmem>>, %arg6: memref<128x256xbf16, #tpu.memory_space<vmem>>, %arg7: memref<16x256xf32, #tpu.memory_space<vmem>>) attributes {dimension_semantics = [#tpu.dimension_semantics<parallel>], iteration_bounds = array<i64: 1>, scalar_prefetch = 0 : i64, scratch_operands = 0 : i64, tpu.core_type = #tpu.core_type<tc>, window_params = [{transform_indices = @transform_0, window_bounds = array<i64: 16, 128>}, {transform_indices = @transform_1, window_bounds = array<i64: 16, 256>}, {transform_indices = @transform_2, window_bounds = array<i64: 16, 128>}, {pipeline_mode = #tpu.pipeline_mode<synchronous>, transform_indices = @transform_3, window_bounds = array<i64: 1, 128>}, {pipeline_mode = #tpu.pipeline_mode<synchronous>, transform_indices = @transform_4, window_bounds = array<i64: 256, 128>}, {pipeline_mode = #tpu.pipeline_mode<synchronous>, transform_indices = @transform_5, window_bounds = array<i64: 128, 256>}, {transform_indices = @transform_6, window_bounds = array<i64: 16, 256>}]} {
    %c0 = arith.constant 0 : index
    %c0_0 = arith.constant 0 : index
    %0 = vector.load %arg2[%c0, %c0_0] : memref<16x256xf32, #tpu.memory_space<vmem>>, vector<16x256xf32>
    %c0_1 = arith.constant 0 : index
    %c0_2 = arith.constant 0 : index
    %1 = vector.load %arg1[%c0_1, %c0_2] : memref<16x128xf32, #tpu.memory_space<vmem>>, vector<16x128xf32>
    %2 = arith.truncf %0 : vector<16x256xf32> to vector<16x256xbf16>
    %c0_3 = arith.constant 0 : index
    %c0_4 = arith.constant 0 : index
    %3 = vector.load %arg5[%c0_3, %c0_4] : memref<256x128xbf16, #tpu.memory_space<vmem>>, vector<256x128xbf16>
    %cst = arith.constant dense<0.000000e+00> : vector<16x128xf32>
    %4 = tpu.matmul %2, %3, %cst {dimension_numbers = #tpu.dot_dimension_numbers<[1], [0], [0], [1], [0, 0, 1, 1], [], []>} : vector<16x256xbf16>, vector<256x128xbf16>, vector<16x128xf32> -> vector<16x128xf32>
    %5 = arith.subf %1, %4 : vector<16x128xf32>
    %c0_5 = arith.constant 0 : index
    %c0_6 = arith.constant 0 : index
    %6 = vector.load %arg4[%c0_5, %c0_6] : memref<1x128xf32, #tpu.memory_space<vmem>>, vector<1x128xf32>
    %c0_7 = arith.constant 0 : index
    %c0_8 = arith.constant 0 : index
    %7 = vector.load %arg3[%c0_7, %c0_8] : memref<16x128xf32, #tpu.memory_space<vmem>>, vector<16x128xf32>
    %8 = vector.broadcast %6 : vector<1x128xf32> to vector<16x128xf32>
    %9 = arith.addf %8, %7 : vector<16x128xf32>
    %10 = tpu.reciprocal %9 {approx = true} : vector<16x128xf32> -> vector<16x128xf32>
    %11 = vector.broadcast %6 : vector<1x128xf32> to vector<16x128xf32>
    %12 = arith.mulf %11, %10 : vector<16x128xf32>
    %13 = arith.mulf %12, %5 : vector<16x128xf32>
    %14 = arith.truncf %13 : vector<16x128xf32> to vector<16x128xbf16>
    %c0_9 = arith.constant 0 : index
    %c0_10 = arith.constant 0 : index
    %15 = vector.load %arg6[%c0_9, %c0_10] : memref<128x256xbf16, #tpu.memory_space<vmem>>, vector<128x256xbf16>
    %cst_11 = arith.constant dense<0.000000e+00> : vector<16x256xf32>
    %16 = tpu.matmul %14, %15, %cst_11 {dimension_numbers = #tpu.dot_dimension_numbers<[1], [0], [0], [1], [0, 0, 1, 1], [], []>} : vector<16x128xbf16>, vector<128x256xbf16>, vector<16x256xf32> -> vector<16x256xf32>
    %17 = arith.addf %0, %16 : vector<16x256xf32>
    %c0_12 = arith.constant 0 : index
    %c0_13 = arith.constant 0 : index
    %18 = vector.load %arg7[%c0_12, %c0_13] : memref<16x256xf32, #tpu.memory_space<vmem>>, vector<16x256xf32>
    tpu.vector_store %arg7[%c0_12, %c0_13], %17 {strides = array<i32>} : memref<16x256xf32, #tpu.memory_space<vmem>>, vector<16x256xf32>,
    return
  }
  func.func @transform_0(%arg0: i32) -> (i32, i32) {
    %c0_i32 = arith.constant 0 : i32
    %c0_i32_0 = arith.constant 0 : i32
    return %arg0, %c0_i32 : i32, i32
  }
  func.func @transform_1(%arg0: i32) -> (i32, i32) {
    %c0_i32 = arith.constant 0 : i32
    %c0_i32_0 = arith.constant 0 : i32
    return %arg0, %c0_i32 : i32, i32
  }
  func.func @transform_2(%arg0: i32) -> (i32, i32) {
    %c0_i32 = arith.constant 0 : i32
    %c0_i32_0 = arith.constant 0 : i32
    return %arg0, %c0_i32 : i32, i32
  }
  func.func @transform_3(%arg0: i32) -> (i32, i32) {
    %c0_i32 = arith.constant 0 : i32
    %c0_i32_0 = arith.constant 0 : i32
    %c0_i32_1 = arith.constant 0 : i32
    return %c0_i32, %c0_i32_0 : i32, i32
  }
  func.func @transform_4(%arg0: i32) -> (i32, i32) {
    %c0_i32 = arith.constant 0 : i32
    %c0_i32_0 = arith.constant 0 : i32
    %c0_i32_1 = arith.constant 0 : i32
    return %c0_i32, %c0_i32_0 : i32, i32
  }
  func.func @transform_5(%arg0: i32) -> (i32, i32) {
    %c0_i32 = arith.constant 0 : i32
    %c0_i32_0 = arith.constant 0 : i32
    %c0_i32_1 = arith.constant 0 : i32
    return %c0_i32, %c0_i32_0 : i32, i32
  }
  func.func @transform_6(%arg0: i32) -> (i32, i32) {
    %c0_i32 = arith.constant 0 : i32
    %c0_i32_0 = arith.constant 0 : i32
    return %arg0, %c0_i32 : i32, i32
  }
}

</mosaic_0001>

<bundles_post_ra>
// kernel: forward.1
= control target key start
LH: loop header
LB: loop body
LE: loop exit
PB: predicated region body
PF: predicated region fallthrough
CT: control target
= control target key end

     0   :  { %s694_s0 = inlined_call_operand.vmem [shape: f32[10,128], index: 0, kind: input, shape index: {}]   ;;  %s695_s1 = inlined_call_operand.vmem [shape: f32[10,256], index: 1, kind: input, shape index: {}]   ;;  %s696_s2 = inlined_call_operand.vmem [shape: f32[10,128], index: 2, kind: input, shape index: {}]   ;;  %s697_s3 = inlined_call_operand.vmem [shape: f32[1,128], index: 3, kind: input, shape index: {}]   ;;  %s698_s4 = inlined_call_operand.vmem [shape: bf16[256,128], index: 4, kind: input, shape index: {}]   ;;  %s699_s5 = inlined_call_operand.vmem [shape: bf16[128,256], index: 5, kind: input, shape index: {}]   ;;  %s700_s6 = inlined_call_operand.hbm [shape: f32[10,256], index: 6, kind: output, shape index: {}]  }
   0x1   :  { %v444_v0 = vld [vmem:[%s698_s4 + $0x40] sm:$0xff]   ;;  %v446_v2 = vld [vmem:[%s698_s4 + $0x48] sm:$0xff]   ;;  %v448_v4 = vld [vmem:[%s698_s4 + $0x50] sm:$0xff]  }
   0x2   :  { %v445_v1 = vld [vmem:[%s698_s4] sm:$0xff]   ;;  %418 = vmatprep.subr.bf16.mxu0 %v444_v0  ;;  %v447_v3 = vld [vmem:[%s698_s4 + $0x8] sm:$0xff]   ;;  %v449_v5 = vld [vmem:[%s698_s4 + $0x10] sm:$0xff]  }
   0x3   :  { %419 = vmatpush3.bf16.msra.mxu0 %v445_v1  ;;  %v450_v6 = vld [vmem:[%s698_s4 + $0x58] sm:$0xff]   ;;  %v452_v8 = vld [vmem:[%s698_s4 + $0x60] sm:$0xff]   ;;  %v454_v10 = vld [vmem:[%s698_s4 + $0x68] sm:$0xff]  }
   0x4   :  { %420 = vmatprep.subr.bf16.mxu0 %v446_v2  ;;  %v451_v7 = vld [vmem:[%s698_s4 + $0x18] sm:$0xff]   ;;  %v453_v9 = vld [vmem:[%s698_s4 + $0x20] sm:$0xff]   ;;  %v587_v11 = vld [vmem:[%s695_s1 + $0x8] sm:$0xff] }
   0x5   :  { %v592_v12 = vld [vmem:[%s695_s1 + $0x18] sm:$0xff]  ;;  %v460_v14 = vld [vmem:[%s699_s5 + $0x4] ss:$8 sps:$4 sm:$0xff]   ;;  %v462_v15 = vld [vmem:[%s699_s5] ss:$8 sps:$4 sm:$0xff]  }
   0x6   :  { %v32_v13 = vpack.c.bf16 %v592_v12, %v587_v11  ;;  %v455_v16 = vld [vmem:[%s698_s4 + $0x28] sm:$0xff]   ;;  %v463_v17 = vld [vmem:[%s699_s5 + $0x14] ss:$8 sps:$4 sm:$0xff]   ;;  %318 = vmatprep.subr.bf16.mxu1 %v460_v14  ;;  %v465_v19 = vld [vmem:[%s699_s5 + $0x10] ss:$8 sps:$4 sm:$0xff]  }
   0x7   :  { %421 = vmatpush3.bf16.msra.mxu0 %v447_v3  ;;  %v456_v18 = vld [vmem:[%s698_s4 + $0x70] sm:$0xff]   ;;  %319 = vmatpush1.bf16.msra.mxu1 %v462_v15  ;;  %v466_v21 = vld [vmem:[%s699_s5 + $0x24] ss:$8 sps:$4 sm:$0xff]   ;;  %v458_v22 = vld [vmem:[%s698_s4 + $0x78] sm:$0xff]  }
   0x8   :  { %422 = vmatprep.subr.bf16.mxu0 %v448_v4  ;;  %193 = vmatprep.mubr.bf16.mxu0 %v32_v13  ;;  %v457_v20 = vld [vmem:[%s698_s4 + $0x30] sm:$0xff]   ;;  %v468_v23 = vld [vmem:[%s699_s5 + $0x20] ss:$8 sps:$4 sm:$0xff]  }
   0x9   :  { %320 = vmatprep.subr.bf16.mxu1 %v463_v17  ;;  %v469_v24 = vld [vmem:[%s699_s5 + $0x34] ss:$8 sps:$4 sm:$0xff]  }
   0xb   :  { %423 = vmatpush3.bf16.msra.mxu0 %v449_v5  ;;  %321 = vmatpush1.bf16.msra.mxu1 %v465_v19 }
   0xc   :  { %424 = vmatprep.subr.bf16.mxu0 %v450_v6  ;;  %322 = vmatprep.subr.bf16.mxu1 %v466_v21 }
   0xf   :  { %425 = vmatpush3.bf16.msra.mxu0 %v451_v7 }
  0x10   :  { %426 = vmatprep.subr.bf16.mxu0 %v452_v8 }
  0x13   :  { %427 = vmatpush3.bf16.msra.mxu0 %v453_v9 }
  0x14   :  { %428 = vmatprep.subr.bf16.mxu0 %v454_v10 }
  0x17   :  { %429 = vmatpush3.bf16.msra.mxu0 %v455_v16 }
  0x18   :  { %430 = vmatprep.subr.bf16.mxu0 %v456_v18 }
  0x19   :  { %11 = vsyncpa [#allocation3], 0  ;;  %v459_v25 = vld [vmem:[%s698_s4 + $0x38] sm:$0xff]   ;;  %v25_v26 = vld [vmem:[%s695_s1] sm:$0xff]  ;;  %323 = vmatpush1.bf16.msra.mxu1 %v468_v23  ;;  %v512_v38 = vmov 0  }
  0x1a   :  { %v27_v27 = vld [vmem:[%s695_s1 + $0x10] sm:$0xff]  ;;  %324 = vmatprep.subr.bf16.mxu1 %v469_v24  ;;  %v472_v30 = vld [vmem:[%s699_s5 + $0x44] ss:$8 sps:$4 sm:$0xff]   ;;  %v474_v31 = vld [vmem:[%s699_s5 + $0x40] ss:$8 sps:$4 sm:$0xff]   ;;  %350 = vmatprep.mubr.bf16.mxu1 %v512_v38 }
  0x1b   :  { %431 = vmatpush3.bf16.msra.mxu0 %v457_v20  ;;  %v471_v28 = vld [vmem:[%s699_s5 + $0x30] ss:$8 sps:$4 sm:$0xff]   ;;  %v31_v29 = vpack.c.bf16 %v27_v27, %v25_v26  ;;  %v475_v32 = vld [vmem:[%s699_s5 + $0x54] ss:$8 sps:$4 sm:$0xff]   ;;  %v478_v34 = vld [vmem:[%s699_s5 + $0x64] ss:$8 sps:$4 sm:$0xff]  }
  0x1c   :  { %432 = vmatprep.subr.bf16.mxu0 %v458_v22  ;;  %v477_v33 = vld [vmem:[%s699_s5 + $0x50] ss:$8 sps:$4 sm:$0xff]   ;;  %v480_v35 = vld [vmem:[%s699_s5 + $0x60] ss:$8 sps:$4 sm:$0xff]   ;;  %v481_v36 = vld [vmem:[%s699_s5 + $0x74] ss:$8 sps:$4 sm:$0xff]  }
  0x1d   :  { %325 = vmatpush1.bf16.msra.mxu1 %v471_v28  ;;  %v483_v37 = vld [vmem:[%s699_s5 + $0x70] ss:$8 sps:$4 sm:$0xff]   ;;  %v401_v39 = vld [vmem:[%s697_s3] ss:$0 sm:$0xff]  ;;  %v206_v41 = vld [vmem:[%s696_s2 + $0x8] sm:$0xff] }
  0x1e   :  { %326 = vmatprep.subr.bf16.mxu1 %v472_v30  ;;  %v205_v40 = vld [vmem:[%s696_s2] sm:$0xff]  ;;  %v214_v43 = vadd.f32 %v401_v39, %v206_v41  ;;  %v30_v51 = vld [vmem:[%s694_s0 + $0x8] sm:$0xff]  ;;  %s513_s2 = smov [#allocation2]  }
  0x1f   :  { %433 = vmatpush3.bf16.msra.mxu0 %v459_v25  ;;  %v213_v42 = vadd.f32 %v401_v39, %v205_v40  ;;  %v29_v47 = vld [vmem:[%s694_s0] sm:$0xff]  ;;  %s374_s27 = sshll.u32 %s513_s2, 4  ;;  %s375_s27 = int_to_ptr.vmem [resolvable:$true] %s374_s27 }
  0x20   :  { %s488_s0 = scalar_lea.vmem %s375_s27, 512  ;;  %p493_p1 = scmp.lt.s32.totalorder %s375_s27, %s375_s27 }
  0x21   :  { %327 = vmatpush1.bf16.msra.mxu1 %v474_v31  ;;  %484 = vrcp.f32 %v213_v42  ;;  %p489_p0 = scmp.ne.s32.totalorder %s375_s27, %s488_s0  ;;  %p494_p2 = scmp.lt.s32.totalorder %s488_s0, %s488_s0 }
  0x22   :  { %194 = vmatmul.mubr.bf16.vlgmr.msra.gmra.mrb[0].mxu0 %v31_v29  ;;  %328 = vmatprep.subr.bf16.mxu1 %v475_v32  ;;  %486 = vrcp.f32 %v214_v43 }
  0x23   :  { %p495_p3 = por %p494_p2, %p493_p1 }
  0x25   :  { %329 = vmatpush1.bf16.msra.mxu1 %v477_v33  ;;  %p496_p4 = pnand %p495_p3, %p489_p0 }
  0x26   :  { %330 = vmatprep.subr.bf16.mxu1 %v478_v34 }
  0x29   :  { %331 = vmatpush1.bf16.msra.mxu1 %v480_v35 }
  0x2a   :  { %332 = vmatprep.subr.bf16.mxu1 %v481_v36 }
  0x2b   :  { %v485_v44 = vpop.eup %484 }
  0x2c   :  { %v487_v46 = vpop.eup %486  ;;  %v217_v54 = vmul.f32 %v485_v44, %v401_v39 }
  0x2d   :  { %333 = vmatpush1.bf16.msra.mxu1 %v483_v37  ;;  %v218_v56 = vmul.f32 %v487_v46, %v401_v39 }
  0xf5   :  { %v434_v45 = vpop.f32.mrb[0].mxu0 }
  0xf6   :  { %v435_v48 = vpop.f32.mrb[1].mxu0 }
  0xf7   :  { %v436_v49 = vadd.f32 %v435_v48, %v434_v45  ;;  %v437_v50 = vpop.f32.mrb[2].mxu0 }
  0xf8   :  { %v438_v52 = vpop.f32.mrb[3].mxu0 }
  0xf9   :  { %v202_v53 = vsub.f32 %v29_v47, %v436_v49  ;;  %v439_v55 = vadd.f32 %v438_v52, %v437_v50 }
  0xfb   :  { %v203_v57 = vsub.f32 %v30_v51, %v439_v55  ;;  %v219_v58 = vmul.f32 %v217_v54, %v202_v53 }
  0xfd   :  { %v220_v59 = vmul.f32 %v218_v56, %v203_v57 }
  0xff   :  { %v221_v60 = vpack.c.bf16 %v220_v59, %v219_v58 }
 0x101   :  { %351 = vmatmul.mubr.bf16.vlgmr.msra.gmra.mrb[0].mxu1 %v221_v60 }
 0x1d4   :  { %v352_v61 = vpop.f32.mrb[0].mxu1 }
 0x1d5   :  { %v361_v62 = vadd.f32 %v352_v61, %v25_v26  ;;  %v354_v63 = vpop.f32.mrb[1].mxu1 }
 0x1d6   :  { %v362_v0 = vadd.f32 %v354_v63, %v587_v11  ;;  %v356_v1 = vpop.f32.mrb[2].mxu1 }
 0x1d7   :  { %365 = vst [vmem:[#allocation2] sm:$0xff] %v361_v62  ;;  %v363_v2 = vadd.f32 %v356_v1, %v27_v27  ;;  %v358_v3 = vpop.f32.mrb[3].mxu1 }
 0x1d8   :  { %366 = vst [vmem:[#allocation2 + $0x8] sm:$0xff] %v362_v0  ;;  %v364_v4 = vadd.f32 %v358_v3, %v592_v12 }
 0x1d9   :  { %367 = vst [vmem:[#allocation2 + $0x10] sm:$0xff] %v363_v2 }
 0x1da   :  { %368 = vst [vmem:[#allocation2 + $0x18] sm:$0xff] %v364_v4 }
 0x1db   :  { %499 = shalt.err (!%p496_p4)
}
 0x1dc   :  { %s500_s30 = scalar_lea.hbm %s700_s6, 512 }
 0x1dd   :  { %p501_p5 = scmp.ne.s32.totalorder %s700_s6, %s500_s30  ;;  %p504_p6 = scmp.lt.u32.totalorder %s500_s30, %s700_s6 }
 0x1df   :  { %p506_p7 = pnand %p504_p6, %p501_p5 }
 0x1e1   :  { %509 = shalt.err (!%p506_p7)
}
 0x1e2   :  { %s514_s9 = smov 256   ;;  %s515_s10 = smov 16  }
 0x1e3   :  { %380 = dma.vmem_to_hbm [thread:$0]  %s375_s27, 512, %s700_s6, [#allocation3], %s514_s9, %s514_s9, %s515_s10  }
 0x1e4   :  { %510 = dma.done.wait [#allocation3], 512  }
 0x1e5   :  { %511 = vsyncadd [#allocation3], 4294966784 }
 0x1e6   :  { %384 = vsyncpa [#allocation3], 1 }

</bundles_post_ra>
